<compile_context>
chip_gen: v7x
topology: tpu7x:2x2x1
jax: 0.10.0
libtpu: 0.0.40
codegen_flags: <defaults>
</compile_context>

<pallas_src>
import functools

import jax
import jax.numpy as jnp
from jax.experimental import pallas as pl
from jax.experimental.pallas import tpu as pltpu

LANE = 128  # TPU vreg lane width


def _cdiv(a, b):
    return (a + b - 1) // b


def _round_up(x, m):
    return _cdiv(x, m) * m


def _choose_tile(batch, max_tile_rows, *, target_steps=4, min_rows_per_step=4096):
    """Pick a 128-multiple batch tile.

    Large B: cap the tile at `max_tile_rows` (VMEM budget, per-entry-point)
    and give the grid >= `target_steps` steps so v7x can shard them across its
    2 TensorCores.  Small B: a single tile (splitting tiny work only adds
    ~0.35us per extra grid step).
    """
    b128 = _round_up(max(int(batch), 1), LANE)
    steps_vmem = _cdiv(b128, max_tile_rows)
    steps_cores = target_steps if b128 >= target_steps * min_rows_per_step else 1
    steps = max(steps_vmem, steps_cores)
    tb = _round_up(_cdiv(b128, steps), LANE)
    return min(tb, _round_up(max_tile_rows, LANE))


def _mlp_from_z1(z1, w2, b2, w3, b3, tanh_dtype):
    # z1: (16, tb) float32 pre-activation of layer 1 (lane-major, batch on lanes).
    # tanh runs in `tanh_dtype` (bf16 ~doubles EUP throughput on v6e/v7x; keep
    # f32 on v5e); matmul accumulation is always float32.
    h1 = jnp.tanh(z1.astype(tanh_dtype))                                   # (16, tb)
    z2 = jnp.dot(w2.astype(tanh_dtype), h1,
                 preferred_element_type=jnp.float32) + b2                  # (16, tb) f32
    h2 = jnp.tanh(z2.astype(tanh_dtype))                                   # (16, tb)
    return jnp.dot(w3.astype(tanh_dtype), h2,
                   preferred_element_type=jnp.float32) + b3                # (1, tb) f32


def _critic_kernel_lane_major(x_ref, w1_ref, b1_ref, w2_ref, b2_ref,
                              w3_ref, b3_ref, o_ref, *, tanh_dtype):
    # x_ref: (n_state, tb) lane-major tile (batch on the 128-lane axis).
    x = x_ref[...].astype(jnp.float32)
    z1 = jnp.dot(w1_ref[...], x, preferred_element_type=jnp.float32) + b1_ref[...]
    out = _mlp_from_z1(z1, w2_ref[...], b2_ref[...], w3_ref[...], b3_ref[...],
                       tanh_dtype)
    o_ref[...] = out.astype(o_ref.dtype)                                   # lane-dense store


def _critic_kernel_row_major(x_ref, w1_ref, b1_ref, w2_ref, b2_ref,
                             w3_ref, b3_ref, o_ref, *, tanh_dtype):
    # x_ref: (tb, n_state) row-major tile.  Transpose once on the narrow input
    # (fused into the MXU op / cheap XLU work, hidden under DMA) and run
    # lane-major after that.
    x = x_ref[...].astype(jnp.float32)                                     # (tb, n_state)
    z1 = jnp.dot(w1_ref[...], x.T, preferred_element_type=jnp.float32) + b1_ref[...]
    out = _mlp_from_z1(z1, w2_ref[...], b2_ref[...], w3_ref[...], b3_ref[...],
                       tanh_dtype)
    o_ref[...] = out.astype(o_ref.dtype)


def _resident(shape):
    # Whole (tiny) weight/bias stays VMEM-resident across all grid steps.
    return pl.BlockSpec(shape, lambda i: (0, 0))


def _run_critic(kernel, x, params, x_spec, tb, batch, tanh_dtype):
    w1, b1 = params["w1"], params["b1"]
    w2, b2 = params["w2"], params["b2"]
    w3, b3 = params["w3"], params["b3"]
    grid = (_cdiv(batch, tb),)
    out_lm = pl.pallas_call(
        functools.partial(kernel, tanh_dtype=tanh_dtype),
        out_shape=jax.ShapeDtypeStruct((1, batch), jnp.float32),
        grid=grid,
        in_specs=[
            x_spec,                       # batch tile, moves with the grid
            _resident(w1.shape),          # (16, n_state)
            _resident(b1.shape),          # (16, 1)
            _resident(w2.shape),          # (16, 16)
            _resident(b2.shape),          # (16, 1)
            _resident(w3.shape),          # (1, 16)
            _resident(b3.shape),          # (1, 1)
        ],
        out_specs=pl.BlockSpec((1, tb), lambda i: (0, i)),   # lane-dense output tile
        compiler_params=pltpu.CompilerParams(
            dimension_semantics=("parallel",)),
    )(x, w1, b1, w2, b2, w3, b3)
    return out_lm                                             # (1, batch) f32


def critic_forward(x, params, *, tanh_dtype=jnp.float32, max_tile_rows=8192):
    """PyTorch-interface entry: x is (B, n_state) row-major.

    No wrapper-side transpose / pad / cast of x.  Tile capped at 8K rows
    because the (tb, n_state) f32 tile lane-pads n_state -> 128 in VMEM.
    Pass bf16 x on v6e/v7x to halve input HBM traffic; set
    tanh_dtype=jnp.bfloat16 on v6e/v7x if EUP-bound (keep f32 on v5e).
    Returns (B, 1) float32.
    """
    B, _n_state = x.shape
    tb = _choose_tile(B, max_tile_rows)
    x_spec = pl.BlockSpec((tb, _n_state), lambda i: (i, 0))
    out_lm = _run_critic(_critic_kernel_row_major, x, params, x_spec, tb, B,
                         tanh_dtype)
    return out_lm.T                                            # (B, 1)


def critic_forward_lane_major(x_lm, params, *, tanh_dtype=jnp.float32,
                              max_tile_rows=65536):
    """Fast path: x_lm is (n_state, B) lane-major (batch on the lane axis).

    Big streaming tiles (default 64K rows, ~1 MB/step f32 input DMA), >= 4
    grid steps for large B (v7x dual-TC), no VMEM lane inflation.
    Returns (B, 1) float32.
    """
    _n_state, B = x_lm.shape
    tb = _choose_tile(B, max_tile_rows)
    x_spec = pl.BlockSpec((_n_state, tb), lambda i: (0, i))
    out_lm = _run_critic(_critic_kernel_lane_major, x_lm, params, x_spec, tb, B,
                         tanh_dtype)
    return out_lm.T                                            # (B, 1)


def init_critic_params(key, n_state):
    """PyTorch nn.Linear default init: U(-k, k), k = 1/sqrt(fan_in).
    Weights stored as (out_features, in_features), biases as (out_features, 1)."""
    def linear(key, fan_in, fan_out):
        k = 1.0 / jnp.sqrt(jnp.float32(fan_in))
        kw, kb = jax.random.split(key)
        w = jax.random.uniform(kw, (fan_out, fan_in), jnp.float32, -k, k)
        b = jax.random.uniform(kb, (fan_out, 1), jnp.float32, -k, k)
        return w, b

    k1, k2, k3 = jax.random.split(key, 3)
    w1, b1 = linear(k1, n_state, 16)
    w2, b2 = linear(k2, 16, 16)
    w3, b3 = linear(k3, 16, 1)
    return {"w1": w1, "b1": b1, "w2": w2, "b2": b2, "w3": w3, "b3": b3}


def critic_ref(x, p):
    h1 = jnp.tanh(x @ p["w1"].T + p["b1"].T)
    h2 = jnp.tanh(h1 @ p["w2"].T + p["b2"].T)
    return h2 @ p["w3"].T + p["b3"].T


if __name__ == "__main__":
    key = jax.random.PRNGKey(0)
    kx, kx2, kx3, kp = jax.random.split(key, 4)

    n_state = 4
    params = init_critic_params(kp, n_state)

    # 1) Small RL-style batch: single grid step, partial (OOB-masked) block.
    B = 8
    x = jax.random.normal(kx, (B, n_state), jnp.float32)
    out = jax.block_until_ready(critic_forward(x, params))
    ref = critic_ref(x, params)
    assert out.shape == (B, 1)
    assert jnp.allclose(out, ref, atol=1e-5, rtol=1e-5)

    # 2) Non-128-multiple batch, no padding copy, single adaptive tile.
    B2 = 2500
    x2 = jax.random.normal(kx2, (B2, n_state), jnp.float32)
    out2 = jax.block_until_ready(critic_forward(x2, params))
    ref2 = critic_ref(x2, params)
    assert out2.shape == (B2, 1)
    assert jnp.allclose(out2, ref2, atol=1e-5, rtol=1e-5)

    # 3) Larger batch: exercises the multi-step "parallel" grid (>= 4 steps)
    #    on both the row-major and the lane-major (preferred) entry points.
    B3 = 16500
    x3 = jax.random.normal(kx3, (B3, n_state), jnp.float32)
    out3 = jax.block_until_ready(critic_forward(x3, params))
    ref3 = critic_ref(x3, params)
    assert out3.shape == (B3, 1)
    assert jnp.allclose(out3, ref3, atol=1e-5, rtol=1e-5)

    out3_lm = jax.block_until_ready(critic_forward_lane_major(x3.T, params))
    assert out3_lm.shape == (B3, 1)
    assert jnp.allclose(out3_lm, ref3, atol=1e-5, rtol=1e-5)

    # 4) bf16 input path (halves input DMA on v6e/v7x); compute stays f32, so
    #    it matches the f32 reference evaluated on the bf16-rounded input.
    x2_bf16 = x2.astype(jnp.bfloat16)
    out_bf = jax.block_until_ready(critic_forward(x2_bf16, params))
    ref_bf = critic_ref(x2_bf16.astype(jnp.float32), params)
    assert jnp.allclose(out_bf, ref_bf, atol=1e-4, rtol=1e-4)

    # 5) bf16-tanh path (EUP lever on v6e/v7x); relaxed tolerance vs f32 ref.
    out_bt = jax.block_until_ready(
        critic_forward(x3, params, tanh_dtype=jnp.bfloat16))
    assert jnp.allclose(out_bt, ref3, atol=1e-1, rtol=1e-1)

    print("KERNEL_OK")
</pallas_src>

<mosaic_0001>
module attributes {stable_mosaic.version = 11 : i64} {
  func.func @_critic_kernel_row_major(%arg0: i32, %arg1: memref<128x4xf32, #tpu.memory_space<vmem>>, %arg2: memref<16x4xf32, #tpu.memory_space<vmem>>, %arg3: memref<16x1xf32, #tpu.memory_space<vmem>>, %arg4: memref<16x16xf32, #tpu.memory_space<vmem>>, %arg5: memref<16x1xf32, #tpu.memory_space<vmem>>, %arg6: memref<1x16xf32, #tpu.memory_space<vmem>>, %arg7: memref<1x1xf32, #tpu.memory_space<vmem>>, %arg8: memref<1x128xf32, #tpu.memory_space<vmem>>) attributes {dimension_semantics = [#tpu.dimension_semantics<parallel>], iteration_bounds = array<i64: 1>, scalar_prefetch = 0 : i64, scratch_operands = 0 : i64, tpu.core_type = #tpu.core_type<tc>, window_params = [{transform_indices = @transform_0, window_bounds = array<i64: 128, 4>}, {pipeline_mode = #tpu.pipeline_mode<synchronous>, transform_indices = @transform_1, window_bounds = array<i64: 16, 4>}, {pipeline_mode = #tpu.pipeline_mode<synchronous>, transform_indices = @transform_2, window_bounds = array<i64: 16, 1>}, {pipeline_mode = #tpu.pipeline_mode<synchronous>, transform_indices = @transform_3, window_bounds = array<i64: 16, 16>}, {pipeline_mode = #tpu.pipeline_mode<synchronous>, transform_indices = @transform_4, window_bounds = array<i64: 16, 1>}, {pipeline_mode = #tpu.pipeline_mode<synchronous>, transform_indices = @transform_5, window_bounds = array<i64: 1, 16>}, {pipeline_mode = #tpu.pipeline_mode<synchronous>, transform_indices = @transform_6, window_bounds = array<i64: 1, 1>}, {transform_indices = @transform_7, window_bounds = array<i64: 1, 128>}]} {
    %c0 = arith.constant 0 : index
    %c0_0 = arith.constant 0 : index
    %0 = vector.load %arg1[%c0, %c0_0] : memref<128x4xf32, #tpu.memory_space<vmem>>, vector<128x4xf32>
    %c0_1 = arith.constant 0 : index
    %c0_2 = arith.constant 0 : index
    %1 = vector.load %arg2[%c0_1, %c0_2] : memref<16x4xf32, #tpu.memory_space<vmem>>, vector<16x4xf32>
    %2 = tpu.transpose %0, [1, 0] : vector<128x4xf32> -> vector<4x128xf32>
    %cst = arith.constant dense<0.000000e+00> : vector<16x128xf32>
    %3 = tpu.matmul %1, %2, %cst {dimension_numbers = #tpu.dot_dimension_numbers<[1], [0], [0], [1], [0, 0, 1, 1], [], []>} : vector<16x4xf32>, vector<4x128xf32>, vector<16x128xf32> -> vector<16x128xf32>
    %c0_3 = arith.constant 0 : index
    %c0_4 = arith.constant 0 : index
    %4 = vector.load %arg3[%c0_3, %c0_4] : memref<16x1xf32, #tpu.memory_space<vmem>>, vector<16x1xf32>
    %5 = vector.broadcast %4 : vector<16x1xf32> to vector<16x128xf32>
    %6 = arith.addf %3, %5 : vector<16x128xf32>
    %c0_5 = arith.constant 0 : index
    %c0_6 = arith.constant 0 : index
    %7 = vector.load %arg4[%c0_5, %c0_6] : memref<16x16xf32, #tpu.memory_space<vmem>>, vector<16x16xf32>
    %c0_7 = arith.constant 0 : index
    %c0_8 = arith.constant 0 : index
    %8 = vector.load %arg5[%c0_7, %c0_8] : memref<16x1xf32, #tpu.memory_space<vmem>>, vector<16x1xf32>
    %c0_9 = arith.constant 0 : index
    %c0_10 = arith.constant 0 : index
    %9 = vector.load %arg6[%c0_9, %c0_10] : memref<1x16xf32, #tpu.memory_space<vmem>>, vector<1x16xf32>
    %c0_11 = arith.constant 0 : index
    %c0_12 = arith.constant 0 : index
    %10 = vector.load %arg7[%c0_11, %c0_12] : memref<1x1xf32, #tpu.memory_space<vmem>>, vector<1x1xf32>
    %11 = math.tanh %6 : vector<16x128xf32>
    %cst_13 = arith.constant dense<0.000000e+00> : vector<16x128xf32>
    %12 = tpu.matmul %7, %11, %cst_13 {dimension_numbers = #tpu.dot_dimension_numbers<[1], [0], [0], [1], [0, 0, 1, 1], [], []>} : vector<16x16xf32>, vector<16x128xf32>, vector<16x128xf32> -> vector<16x128xf32>
    %13 = vector.broadcast %8 : vector<16x1xf32> to vector<16x128xf32>
    %14 = arith.addf %12, %13 : vector<16x128xf32>
    %15 = math.tanh %14 : vector<16x128xf32>
    %cst_14 = arith.constant dense<0.000000e+00> : vector<1x128xf32>
    %16 = tpu.matmul %9, %15, %cst_14 {dimension_numbers = #tpu.dot_dimension_numbers<[1], [0], [0], [1], [0, 0, 1, 1], [], []>} : vector<1x16xf32>, vector<16x128xf32>, vector<1x128xf32> -> vector<1x128xf32>
    %17 = vector.broadcast %10 : vector<1x1xf32> to vector<1x128xf32>
    %18 = arith.addf %16, %17 : vector<1x128xf32>
    %c0_15 = arith.constant 0 : index
    %c0_16 = arith.constant 0 : index
    %19 = vector.load %arg8[%c0_15, %c0_16] : memref<1x128xf32, #tpu.memory_space<vmem>>, vector<1x128xf32>
    tpu.vector_store %arg8[%c0_15, %c0_16], %18 {strides = array<i32>} : memref<1x128xf32, #tpu.memory_space<vmem>>, vector<1x128xf32>,
    return
  }
  func.func @transform_0(%arg0: i32) -> (i32, i32) {
    %c0_i32 = arith.constant 0 : i32
    %c0_i32_0 = arith.constant 0 : i32
    return %arg0, %c0_i32 : i32, i32
  }
  func.func @transform_1(%arg0: i32) -> (i32, i32) {
    %c0_i32 = arith.constant 0 : i32
    %c0_i32_0 = arith.constant 0 : i32
    %c0_i32_1 = arith.constant 0 : i32
    return %c0_i32, %c0_i32_0 : i32, i32
  }
  func.func @transform_2(%arg0: i32) -> (i32, i32) {
    %c0_i32 = arith.constant 0 : i32
    %c0_i32_0 = arith.constant 0 : i32
    %c0_i32_1 = arith.constant 0 : i32
    return %c0_i32, %c0_i32_0 : i32, i32
  }
  func.func @transform_3(%arg0: i32) -> (i32, i32) {
    %c0_i32 = arith.constant 0 : i32
    %c0_i32_0 = arith.constant 0 : i32
    %c0_i32_1 = arith.constant 0 : i32
    return %c0_i32, %c0_i32_0 : i32, i32
  }
  func.func @transform_4(%arg0: i32) -> (i32, i32) {
    %c0_i32 = arith.constant 0 : i32
    %c0_i32_0 = arith.constant 0 : i32
    %c0_i32_1 = arith.constant 0 : i32
    return %c0_i32, %c0_i32_0 : i32, i32
  }
  func.func @transform_5(%arg0: i32) -> (i32, i32) {
    %c0_i32 = arith.constant 0 : i32
    %c0_i32_0 = arith.constant 0 : i32
    %c0_i32_1 = arith.constant 0 : i32
    return %c0_i32, %c0_i32_0 : i32, i32
  }
  func.func @transform_6(%arg0: i32) -> (i32, i32) {
    %c0_i32 = arith.constant 0 : i32
    %c0_i32_0 = arith.constant 0 : i32
    %c0_i32_1 = arith.constant 0 : i32
    return %c0_i32, %c0_i32_0 : i32, i32
  }
  func.func @transform_7(%arg0: i32) -> (i32, i32) {
    %c0_i32 = arith.constant 0 : i32
    %c0_i32_0 = arith.constant 0 : i32
    return %c0_i32, %arg0 : i32, i32
  }
}

</mosaic_0001>

<bundles_post_ra>
// kernel: tpu_custom_call.1
= control target key start
LH: loop header
LB: loop body
LE: loop exit
PB: predicated region body
PF: predicated region fallthrough
CT: control target
= control target key end

     0   :  { %s755_s0 = inlined_call_operand.vmem [shape: f32[8,4], index: 0, kind: input, shape index: {}]   ;;  %s756_s1 = inlined_call_operand.vmem [shape: f32[16,4], index: 1, kind: input, shape index: {}]   ;;  %s757_s2 = inlined_call_operand.vmem [shape: f32[16,1], index: 2, kind: input, shape index: {}]   ;;  %s758_s3 = inlined_call_operand.vmem [shape: f32[16,16], index: 3, kind: input, shape index: {}]   ;;  %s759_s4 = inlined_call_operand.vmem [shape: f32[16,1], index: 4, kind: input, shape index: {}]   ;;  %s760_s5 = inlined_call_operand.vmem [shape: f32[1,16], index: 5, kind: input, shape index: {}]   ;;  %s761_s6 = inlined_call_operand.<no memory space> [shape: f32[1,1], index: 6, kind: input, shape index: {}]   ;;  %s762_s7 = inlined_call_operand.hbm [shape: f32[1,8], index: 7, kind: output, shape index: {}]  }
   0x1   :  { %v12_v0 = vstv %s761_s6 }
   0x2   :  { %13 = vst [vmem:[#allocation2] sm:$0x1] %v12_v0 }
   0x3   :  { %v29_v1 = vld [vmem:[%s755_s0] sm:$0xff]  ;;  %v30_v2 = vld [vmem:[%s755_s0 + $0x8] sm:$0xff]  ;;  %vm59_vm0 = vcmask 31744   ;;  %v31_v3 = vld [vmem:[%s755_s0 + $0x10] sm:$0xff]  ;;  %v577_v7 = vmov 0  }
   0x4   :  { %v483_v4 = vpack.c.bf16 %v30_v2, %v29_v1  ;;  %vm636_vm1 = vmpackc.low %vm59_vm0, %vm59_vm0  ;;  %v32_v6 = vld [vmem:[%s755_s0 + $0x18] sm:$0xff]  ;;  %543 = vset.pattern.permute.xlu0 %v577_v7  ;;  %544 = vset.pattern.permute.xlu1 %v577_v7  ;;  %v45_v9 = vld [vmem:[%s756_s1] sm:$0xff] }
   0x5   :  { %v489_v8 = vpack.c.bf16 %v32_v6, %v31_v3  ;;  %v33_v10 = vld [vmem:[%s755_s0 + $0x20] sm:$0xff]  ;;  %v34_v11 = vld [vmem:[%s755_s0 + $0x28] sm:$0xff]  ;;  %466 = vmatprep.mubr.msk.f32.mxu0 %vm59_vm0, %v45_v9 }
   0x6   :  { %485 = vmatprep.subr.msk.bf16.mxu0 %vm636_vm1, %v483_v4  ;;  %v47_v12 = vld [vmem:[%s757_s2] sm:$0xff] }
   0x7   :  { %488 = vmatpush3.bf16.xpose.msk.msra.mxu0 %vm636_vm1, %v483_v4  ;;  %51 = vperm.xlu0 %543, %v47_v12  }
   0x8   :  { %491 = vmatprep.subr.msk.bf16.mxu0 %vm636_vm1, %v489_v8 }
   0x9   :  { %14 = vsyncpa [#allocation4], 0  ;;  %v48_v13 = vld [vmem:[%s757_s2 + $0x8] sm:$0xff]  ;;  %v495_v14 = vpack.c.bf16 %v34_v11, %v33_v10  ;;  %v194_v15 = vld [vmem:[#allocation2] sm:$0x1]  ;;  %vm207_vm2 = vcmask 130048   ;;  %v296_v57 = vlaneseq }
   0xa   :  { %v35_v16 = vld [vmem:[%s755_s0 + $0x30] sm:$0xff]  ;;  %v36_v17 = vld [vmem:[%s755_s0 + $0x38] sm:$0xff]  ;;  %v37_v19 = vld [vmem:[%s755_s0 + $0x40] sm:$0xff]  ;;  %v578_v45 = vmov 0.0|0.0   ;;  %vm579_vm3 = vmmov 0   ;;  %v580_v46 = vmov 0.0  }
   0xb   :  { %56 = vperm.xlu0 %543, %v48_v13   ;;  %v501_v18 = vpack.c.bf16 %v36_v17, %v35_v16  ;;  %v38_v20 = vld [vmem:[%s755_s0 + $0x48] sm:$0xff]  ;;  %v39_v22 = vld [vmem:[%s755_s0 + $0x50] sm:$0xff]  ;;  %v40_v23 = vld [vmem:[%s755_s0 + $0x58] sm:$0xff]  ;;  %v297_v58 = vshrl.u32 %v296_v57, 7  ;;  %s581_s23 = smov [#allocation3]  }
   0xc   :  { %v507_v21 = vpack.c.bf16 %v38_v20, %v37_v19  ;;  %v513_v24 = vpack.c.bf16 %v40_v23, %v39_v22  ;;  %v41_v25 = vld [vmem:[%s755_s0 + $0x60] sm:$0xff]  ;;  %v42_v26 = vld [vmem:[%s755_s0 + $0x68] sm:$0xff]  ;;  %v43_v28 = vld [vmem:[%s755_s0 + $0x70] sm:$0xff]  ;;  %s380_s2 = sshll.u32 %s581_s23, 4  ;;  %s381_s2 = int_to_ptr.vmem [resolvable:$true] %s380_s2 }
   0xd   :  { %v519_v27 = vpack.c.bf16 %v42_v26, %v41_v25  ;;  %v44_v29 = vld [vmem:[%s755_s0 + $0x78] sm:$0xff]  ;;  %v46_v31 = vld [vmem:[%s756_s1 + $0x8] sm:$0xff]  ;;  %v189_v32 = vld [vmem:[%s758_s3] sm:$0xff]  ;;  %v298_v59 = vsub.s32 0, %v297_v58  ;;  %s553_s24 = scalar_lea.vmem %s381_s2, 16  ;;  %s557_s25 = scalar_lea.vmem %s381_s2, 32 }
   0xe   :  { %v525_v30 = vpack.c.bf16 %v44_v29, %v43_v28  ;;  %473 = vmatprep.mubr.msk.f32.mxu1 %vm207_vm2, %v189_v32  ;;  %v191_v33 = vld [vmem:[%s759_s4] sm:$0xff]  ;;  %v192_v34 = vld [vmem:[%s759_s4 + $0x8] sm:$0xff]  ;;  %p554_p0 = scmp.ne.s32.totalorder %s381_s2, %s553_s24  ;;  %p558_p1 = scmp.lt.s32.totalorder %s381_s2, %s381_s2 }
   0xf   :  { %494 = vmatpush3.bf16.xpose.msk.msra.mxu0 %vm636_vm1, %v489_v8  ;;  %293 = vperm.xlu0 %543, %v194_v15   ;;  %v190_v44 = vld [vmem:[%s758_s3 + $0x8] sm:$0xff]  ;;  %v193_v56 = vld [vmem:[%s760_s5] sm:$0x1]  ;;  %p559_p2 = scmp.lt.s32.totalorder %s557_s25, %s553_s24 }
  0x10   :  { %497 = vmatprep.subr.msk.bf16.mxu0 %vm636_vm1, %v495_v14  ;;  %199 = vperm.xlu1 %544, %v191_v33  }
  0x11   :  { %p560_p3 = por %p559_p2, %p558_p1 }
  0x13   :  { %p561_p4 = pnand %p560_p3, %p554_p0 }
  0x14   :  { %204 = vperm.xlu1 %544, %v192_v34  }
  0x17   :  { %500 = vmatpush3.bf16.xpose.msk.msra.mxu0 %vm636_vm1, %v495_v14 }
  0x18   :  { %503 = vmatprep.subr.msk.bf16.mxu0 %vm636_vm1, %v501_v18 }
  0x1f   :  { %506 = vmatpush3.bf16.xpose.msk.msra.mxu0 %vm636_vm1, %v501_v18 }
  0x20   :  { %509 = vmatprep.subr.msk.bf16.mxu0 %vm636_vm1, %v507_v21 }
  0x27   :  { %512 = vmatpush3.bf16.xpose.msk.msra.mxu0 %vm636_vm1, %v507_v21 }
  0x28   :  { %515 = vmatprep.subr.msk.bf16.mxu0 %vm636_vm1, %v513_v24 }
  0x2f   :  { %518 = vmatpush3.bf16.xpose.msk.msra.mxu0 %vm636_vm1, %v513_v24 }
  0x30   :  { %521 = vmatprep.subr.msk.bf16.mxu0 %vm636_vm1, %v519_v27 }
  0x37   :  { %524 = vmatpush3.bf16.xpose.msk.msra.mxu0 %vm636_vm1, %v519_v27 }
  0x38   :  { %527 = vmatprep.subr.msk.bf16.mxu0 %vm636_vm1, %v525_v30 }
  0x3f   :  { %530 = vmatpush3.bf16.xpose.msk.msra.mxu0 %vm636_vm1, %v525_v30 }
  0x46   :  { %467 = vmatmul.mubr.msk.f32.vlgmr.msra.gmra.mrb[0].mxu0 %vm59_vm0, %v46_v31 }
  0x86   :  { %v52_v35 = vpop.permute.xlu0 %51 }
  0x8a   :  { %v57_v36 = vpop.permute.xlu0 %56 }
  0x8e   :  { %v294_v60 = vpop.permute.xlu0 %293 }
  0x8f   :  { %v200_v47 = vpop.permute.xlu1 %199  ;;  %v299_v61 = vrot.slane %v294_v60, %v298_v59 }
  0x93   :  { %v205_v48 = vpop.permute.xlu1 %204 }
 0x119   :  { %v468_v37 = vpop.f32.mrb[0].mxu0 }
 0x11a   :  { %v186_v38 = vadd.f32 %v468_v37, %v57_v36  ;;  %v180_v39 = vpop.f32.mrb[1].mxu0 }
 0x11b   :  { %v181_v40 = vadd.f32 %v180_v39, %v52_v35 }
 0x11c   :  { %545 = vtanh.f32 %v186_v38 }
 0x11d   :  { %547 = vtanh.f32 %v181_v40 }
 0x126   :  { %v546_v41 = vpop.eup %545 }
 0x127   :  { %v548_v42 = vpop.eup %547 }
 0x128   :  { %v531_v43 = vpack.c.bf16 %v546_v41, %v548_v42 }
 0x12a   :  { %532 = vmatprep.subr.bf16.mxu1 %v531_v43 }
 0x12b   :  { %534 = vmatpush3.bf16.msra.mxu1 %v531_v43 }
 0x12c   :  { %535 = vmatprep.subr.bf16.mxu1 %v578_v45 }
 0x12e   :  { %474 = vmatmul.mubr.msk.f32.vlgmr.msra.gmra.mrb[0].mxu1 %vm207_vm2, %v190_v44 }
 0x12f   :  { %480 = vmatprep.mubr.msk.f32.mxu1 %vm579_vm3, %v580_v46 }
 0x201   :  { %v475_v49 = vpop.f32.mrb[0].mxu1 }
 0x202   :  { %v286_v50 = vadd.f32 %v475_v49, %v205_v48  ;;  %v280_v51 = vpop.f32.mrb[1].mxu1 }
 0x203   :  { %v281_v52 = vadd.f32 %v280_v51, %v200_v47 }
 0x204   :  { %549 = vtanh.f32 %v286_v50 }
 0x205   :  { %551 = vtanh.f32 %v281_v52 }
 0x20e   :  { %v550_v53 = vpop.eup %549 }
 0x20f   :  { %v552_v54 = vpop.eup %551 }
 0x210   :  { %v536_v55 = vpack.c.bf16 %v550_v53, %v552_v54 }
 0x212   :  { %537 = vmatpush3.bf16.msra.mxu1 %v536_v55 }
 0x215   :  { %481 = vmatmul.mubr.msk.f32.vlgmr.msra.gmra.mrb[2].mxu1 %vm207_vm2, %v193_v56 }
 0x2e8   :  { %v369_v62 = vpop.f32.mrb[2].mxu1 }
 0x2e9   :  { %v370_v63 = vadd.f32 %v369_v62, %v299_v61  ;;  %v482_v0 = vpop.f32.mrb[3].mxu1 }
 0x2eb   :  { %373 = vst [vmem:[#allocation3] sm:$0x1] %v370_v63 }
 0x2ec   :  { %564 = shalt.err (!%p561_p4)
}
 0x2ed   :  { %s565_s27 = scalar_lea.hbm %s762_s7, 16 }
 0x2ee   :  { %p566_p5 = scmp.ne.s32.totalorder %s762_s7, %s565_s27  ;;  %p569_p6 = scmp.lt.u32.totalorder %s565_s27, %s762_s7 }
 0x2f0   :  { %p571_p7 = pnand %p569_p6, %p566_p5 }
 0x2f2   :  { %574 = shalt.err (!%p571_p7)
}
 0x2f3   :  { %383 = dma.vmem_to_hbm [thread:$0]  %s381_s2, 16, %s762_s7, [#allocation4]  }
 0x2f4   :  { %575 = dma.done.wait [#allocation4], 16  }
 0x2f5   :  { %576 = vsyncadd [#allocation4], 4294967280 }
 0x2f6   :  { %387 = vsyncpa [#allocation4], 1 }

</bundles_post_ra>
